<compile_context>
chip_gen: v5e
topology: v5e:2x2
jax: 0.10.0
libtpu: 0.0.40
codegen_flags: <defaults>
</compile_context>

<pallas_src>
import jax
import jax.numpy as jnp
from jax.experimental import pallas as pl
from jax.experimental.pallas import tpu as pltpu

_LANE = 128


def _round_up(n, m):
    return ((n + m - 1) // m) * m


def _sublane_for_itemsize(itemsize):
    # Packed sub-32-bit dtypes need second-minor multiples of 16 (bf16) / 32 (8-bit).
    return {4: 8, 2: 16, 1: 32}.get(itemsize, 8)


def _vmem_budget_bytes():
    """Budget for the pipelined tiles; conservative w.r.t. physical VMEM."""
    try:
        cap = pltpu.get_tpu_info().vmem_capacity_bytes
    except Exception:
        cap = 64 << 20  # assume smallest capacity (v7x per-TC: 64 MiB)
    # At most half of physical VMEM, never more than 48 MiB, so Mosaic keeps
    # scratch/spill headroom on every generation.
    return min(cap // 2, 48 << 20)


def _film_kernel(x_ref, g_ref, b_ref, o_ref):
    # relu(g * x + b) on the VPU, one VMEM tile at a time.  g/b blocks may be
    # (1, F) (row-broadcast) or (tile_rows, F); jnp broadcasting handles both.
    x = x_ref[...].astype(jnp.float32)
    g = g_ref[...].astype(jnp.float32)
    b = b_ref[...].astype(jnp.float32)
    o_ref[...] = jnp.maximum(g * x + b, 0.0).astype(o_ref.dtype)


def film(x, gammas, betas):
    """relu(gammas * x + betas).  gammas/betas either match x's shape or are
    per-feature (broadcast over all leading dims)."""
    assert x.dtype == gammas.dtype == betas.dtype, "FiLM expects matching dtypes"

    orig_shape = x.shape
    feat = orig_shape[-1] if x.ndim >= 1 else 1
    x2 = x.reshape(-1, feat)
    n_rows, n_feat = x2.shape

    def _prep_mod(a):
        """Return (2-D view, broadcasts_over_rows)."""
        if a.shape == x.shape:
            return a.reshape(-1, n_feat), False
        if a.ndim >= 1 and a.shape[-1] == n_feat and a.size == n_feat:
            # Per-feature modulation: keep it tiny, broadcast in-kernel.
            return a.reshape(1, n_feat), True
        raise ValueError(
            f"FiLM: modulation shape {a.shape} incompatible with x shape {x.shape}")

    g2, g_bcast = _prep_mod(gammas)
    b2, b_bcast = _prep_mod(betas)

    itemsize = jnp.dtype(x2.dtype).itemsize
    sublane = _sublane_for_itemsize(itemsize)

    # --- Tile sizing: VMEM budget is the only bound (no artificial row cap).
    # Full-size pipelined streams: x + out, plus g/b unless they broadcast.
    n_full_streams = 2 + (0 if g_bcast else 1) + (0 if b_bcast else 1)
    bytes_per_row_pipelined = n_full_streams * 2 * n_feat * itemsize  # x2 double-buffer
    budget = _vmem_budget_bytes()
    budget_rows = max(sublane, (budget // bytes_per_row_pipelined) // sublane * sublane)

    # Ensure >=2 grid blocks when possible so the "parallel" grid axis shards
    # across both TensorCores on v7x (a second step is harmless on 1-TC chips).
    split_rows = _round_up((n_rows + 1) // 2, sublane)
    tile_rows = min(budget_rows, split_rows)
    if tile_rows >= n_rows:
        # Single full block; a block dim equal to the full array dim is exempt
        # from sublane-divisibility, so no masking/padding at all.
        tile_rows = n_rows

    grid = (pl.cdiv(n_rows, tile_rows),)

    full_spec = pl.BlockSpec((tile_rows, n_feat), lambda i: (i, 0))
    bcast_spec = pl.BlockSpec((1, n_feat), lambda i: (0, 0))
    g_spec = bcast_spec if g_bcast else full_spec
    b_spec = bcast_spec if b_bcast else full_spec

    bcast_bytes = (int(g_bcast) + int(b_bcast)) * 2 * n_feat * itemsize
    vmem_limit = int(tile_rows * bytes_per_row_pipelined + bcast_bytes) + (8 << 20)

    cost = pl.CostEstimate(
        flops=2 * n_rows * n_feat,
        transcendentals=0,
        bytes_accessed=(2 * n_rows * n_feat + g2.size + b2.size) * itemsize,
    )

    out = pl.pallas_call(
        _film_kernel,
        out_shape=jax.ShapeDtypeStruct((n_rows, n_feat), x2.dtype),
        grid_spec=pltpu.PrefetchScalarGridSpec(
            num_scalar_prefetch=0,
            grid=grid,
            in_specs=[full_spec, g_spec, b_spec],
            out_specs=full_spec,
        ),
        compiler_params=pltpu.CompilerParams(
            dimension_semantics=("parallel",),
            vmem_limit_bytes=vmem_limit,
        ),
        cost_estimate=cost,
    )(x2, g2, b2)

    return out.reshape(orig_shape)


if __name__ == "__main__":
    # Shapes consistent with the DeepSDF-color-FiLM decoder hidden layers;
    # deliberately non-multiples of 8 / 128 so the partial-trailing-block and
    # unpadded-feature paths are exercised.
    N, F = 37, 259
    key = jax.random.PRNGKey(0)
    kx, kg, kb = jax.random.split(key, 3)

    x = jax.random.normal(kx, (N, F), dtype=jnp.float32)
    gammas = jax.random.normal(kg, (N, F), dtype=jnp.float32)
    betas = jax.random.normal(kb, (N, F), dtype=jnp.float32)

    # 1) Full-shape modulation, f32.
    out = jax.block_until_ready(film(x, gammas, betas))
    ref = jnp.maximum(gammas * x + betas, 0.0)
    assert out.shape == (N, F) and out.dtype == jnp.float32
    assert jnp.allclose(out, ref, atol=1e-6, rtol=1e-6)

    # 2) Per-feature modulation (broadcast over rows in-kernel, no pre-broadcast).
    g1 = jax.random.normal(kg, (F,), dtype=jnp.float32)
    b1 = jax.random.normal(kb, (F,), dtype=jnp.float32)
    out_pf = jax.block_until_ready(film(x, g1, b1))
    ref_pf = jnp.maximum(g1[None, :] * x + b1[None, :], 0.0)
    assert jnp.allclose(out_pf, ref_pf, atol=1e-6, rtol=1e-6)

    # 3) bf16 I/O path (halves HBM bytes for this bandwidth-bound op).
    xb, gb, bb = (a.astype(jnp.bfloat16) for a in (x, gammas, betas))
    out_bf16 = jax.block_until_ready(film(xb, gb, bb))
    ref_bf16 = jnp.maximum(
        gb.astype(jnp.float32) * xb.astype(jnp.float32) + bb.astype(jnp.float32),
        0.0,
    ).astype(jnp.bfloat16)
    assert out_bf16.dtype == jnp.bfloat16
    assert jnp.allclose(out_bf16.astype(jnp.float32),
                        ref_bf16.astype(jnp.float32), atol=1e-2, rtol=1e-2)

    print("KERNEL_OK")
</pallas_src>

<mosaic_0001>
module attributes {stable_mosaic.version = 11 : i64} {
  func.func @_film_kernel(%arg0: i32, %arg1: memref<24x259xf32, #tpu.memory_space<vmem>>, %arg2: memref<24x259xf32, #tpu.memory_space<vmem>>, %arg3: memref<24x259xf32, #tpu.memory_space<vmem>>, %arg4: memref<24x259xf32, #tpu.memory_space<vmem>>) attributes {dimension_semantics = [#tpu.dimension_semantics<parallel>], iteration_bounds = array<i64: 2>, scalar_prefetch = 0 : i64, scratch_operands = 0 : i64, tpu.core_type = #tpu.core_type<tc>, window_params = [{transform_indices = @transform_0, window_bounds = array<i64: 24, 259>}, {transform_indices = @transform_1, window_bounds = array<i64: 24, 259>}, {transform_indices = @transform_2, window_bounds = array<i64: 24, 259>}, {transform_indices = @transform_3, window_bounds = array<i64: 24, 259>}]} {
    %c0 = arith.constant 0 : index
    %c0_0 = arith.constant 0 : index
    %0 = vector.load %arg1[%c0, %c0_0] : memref<24x259xf32, #tpu.memory_space<vmem>>, vector<24x259xf32>
    %c0_1 = arith.constant 0 : index
    %c0_2 = arith.constant 0 : index
    %1 = vector.load %arg2[%c0_1, %c0_2] : memref<24x259xf32, #tpu.memory_space<vmem>>, vector<24x259xf32>
    %c0_3 = arith.constant 0 : index
    %c0_4 = arith.constant 0 : index
    %2 = vector.load %arg3[%c0_3, %c0_4] : memref<24x259xf32, #tpu.memory_space<vmem>>, vector<24x259xf32>
    %3 = arith.mulf %1, %0 : vector<24x259xf32>
    %4 = arith.addf %3, %2 : vector<24x259xf32>
    %cst = arith.constant 0.000000e+00 : f32
    %5 = vector.broadcast %cst : f32 to vector<24x259xf32>
    %6 = arith.maximumf %4, %5 : vector<24x259xf32>
    %c0_5 = arith.constant 0 : index
    %c0_6 = arith.constant 0 : index
    %7 = vector.load %arg4[%c0_5, %c0_6] : memref<24x259xf32, #tpu.memory_space<vmem>>, vector<24x259xf32>
    tpu.vector_store %arg4[%c0_5, %c0_6], %6 {strides = array<i32>} : memref<24x259xf32, #tpu.memory_space<vmem>>, vector<24x259xf32>,
    return
  }
  func.func @transform_0(%arg0: i32) -> (i32, i32) {
    %c0_i32 = arith.constant 0 : i32
    %c0_i32_0 = arith.constant 0 : i32
    return %arg0, %c0_i32 : i32, i32
  }
  func.func @transform_1(%arg0: i32) -> (i32, i32) {
    %c0_i32 = arith.constant 0 : i32
    %c0_i32_0 = arith.constant 0 : i32
    return %arg0, %c0_i32 : i32, i32
  }
  func.func @transform_2(%arg0: i32) -> (i32, i32) {
    %c0_i32 = arith.constant 0 : i32
    %c0_i32_0 = arith.constant 0 : i32
    return %arg0, %c0_i32 : i32, i32
  }
  func.func @transform_3(%arg0: i32) -> (i32, i32) {
    %c0_i32 = arith.constant 0 : i32
    %c0_i32_0 = arith.constant 0 : i32
    return %arg0, %c0_i32 : i32, i32
  }
}

</mosaic_0001>

<bundles_post_ra>
// kernel: tpu_custom_call.1
= control target key start
LH: loop header
LB: loop body
LE: loop exit
PB: predicated region body
PF: predicated region fallthrough
CT: control target
= control target key end

     0   :  { %8 = vsyncpa [#allocation3], 0  ;;  %s1169_s0 = inlined_call_operand.hbm [shape: f32[37,259], index: 0, kind: input, shape index: {}]   ;;  %s1170_s1 = inlined_call_operand.hbm [shape: f32[37,259], index: 1, kind: input, shape index: {}]   ;;  %s1171_s2 = inlined_call_operand.hbm [shape: f32[37,259], index: 2, kind: input, shape index: {}]   ;;  %s1172_s3 = inlined_call_operand.hbm [shape: f32[37,259], index: 3, kind: output, shape index: {}]  }
   0x1   :  { %10 = vsyncpa [#allocation3 + $0x1], 0 }
   0x2   :  { %11 = vsyncpa [#allocation6], 0 }
   0x3   :  { %13 = vsyncpa [#allocation6 + $0x1], 0 }
   0x4   :  { %14 = vsyncpa [#allocation4], 0 }
   0x5   :  { %16 = vsyncpa [#allocation4 + $0x1], 0  ;;  %s847_s12 = smov 0   ;;  %s849_s13 = smov 0  }
   0x6   :  { %s851_s14 = smov 0   ;;  %s853_s15 = smov 0  }
   0x7 LB: > { %s868_s16 = sadd.s32 4294967295, %s813_s15   ;;  %s528_s17 = sadd.s32 4294967294, %s813_s15   ;;  %s813_s15 = sphi %s853_s15, %s1187_s15   ;;  %s809_s14 = sphi %s851_s14, %s1186_s14   ;;  %s805_s13 = sphi %s849_s13, %s1185_s13   ;;  %s801_s12 = sphi %s847_s12, %s1184_s12  }
   0x8   : > { %s872_s18 = sadd.s32 1, %s813_s15   ;;  %s29_s19 = sadd.s32 1, %s809_s14 }
   0x9   : > { %s26_s20 = ssub.s32 %s813_s15, %s872_s18  ;;  %p36_p0 = scmp.ne.s32.totalorder %s809_s14, %s805_s13 }
   0xa   : > { %p27_p1 = scmp.eq.s32.totalorder %s26_s20, 0  ;;  %p37_p2 = scmp.eq.s32.totalorder %s813_s15, 0 }
   0xb   : > { %p42_p3 = scmp.ne.s32.totalorder %s805_s13, %s801_s12  ;;  %p43_p4 = scmp.eq.s32.totalorder %s868_s16, 0 }
   0xc   : > { %s884_s21 = scalar_select %p27_p1, %s809_s14, %s29_s19  }
   0xd   : > { %p886_p5 = por %p37_p2, %p36_p0  ;;  %p890_p6 = por %p43_p4, %p42_p3 }
   0xe   : > { %p118_p7 = scmp.eq.s32.totalorder %s868_s16, 1  ;;  %p124_p8 = scmp.eq.s32.totalorder %s528_s17, 1 }
   0xf   : > { %p1173_p11 = scmp.ge.s32.totalorder %s813_s15, 2 }
  0x10   : > { %p895_p9 = por %p118_p7, %p36_p0  ;;  %p899_p10 = por %p124_p8, %p42_p3 }
  0x11   : > { %140 = sbr.rel (%p1173_p11) target bundleno = 148 (0x94), region = 16 }
  0x12   : > { %s1177_s25 = scalar_select %p899_p10, 1, 0 }
  0x16   : > { %143 = sbr.rel (!%p886_p5) target bundleno = 64 (0x40), region = 20  ;;  %s144_s26 = sand.u32 (%p886_p5), 1, %s809_s14  }
  0x17   : > { %s149_s27 = smul.u32 (%p886_p5), 3, %s813_s15  ;;  %s910_s6 = scalar_lea.sflag (%p886_p5), [#allocation3], %s144_s26 }
  0x18   : > { %s554_s28 = smul.u32 (%p886_p5), 72, %s144_s26 }
  0x19   : > { %s150_s29 = ssub.s32 (%p886_p5), 5, %s149_s27 }
  0x1a   : > { %p151_p12 = scmp.lt.s32.totalorder (%p886_p5), %s150_s29, 3  ;;  %s148_s7 = scalar_lea.vmem (%p886_p5), [#allocation2], %s554_s28 }
  0x1c   : > { %s1189_s29 = smov (!%p151_p12, %s150_s29), 3 }
  0x1d   : > { %s532_s30 = smul.u32 24, %s1189_s29 }
  0x1f   : > { %s155_s4 = ssub.s32 72, %s532_s30 }
  0x20   : > { %s156_s5 = sshll.u32 %s155_s4, 4 }
  0x21   : > { %157 = vsyncadd %s910_s6, %s156_s5  ;;  %p913_p13 = scmp.ne.s32.totalorder %s532_s30, 0  ;;  %s570_s9 = smul.u32 72, %s813_s15 }
  0x22   : > { %s918_s10 = sshll.u32 %s148_s7, 4  ;;  %s920_s11 = smul.u32 384, %s1189_s29  ;;  %s166_s10 = int_to_ptr.vmem [resolvable:$true] %s918_s10 }
  0x23   : > { %s161_s20 = scalar_lea.hbm %s1169_s0, %s570_s9  ;;  %s626_s9 = scalar_lea.hbm %s1169_s0, 120 }
  0x24   : > { %s163_s26 = sshll.u32 %s161_s20, 4  ;;  %s617_s28 = sshrl.u32 %s920_s11, 4  ;;  %s926_s26 = int_to_ptr.hbm [resolvable:$true] %s163_s26 }
  0x25   : > { %s615_s27 = sshra.s32 %s926_s26, 4  ;;  %s653_s30 = sshll.u32 %s617_s28, 4  ;;  %s616_s27 = int_to_ptr.hbm [resolvable:$true] %s615_s27 }
  0x26   : > { %p619_p0 = scmp.ne.s32.totalorder %s653_s30, %s920_s11  ;;  %s620_s4 = sadd.s32 1, %s617_s28 }
  0x27   : > { %p627_p4 = scmp.lt.s32.totalorder %s616_s27, %s1169_s0 }
  0x28   : > { %s1191_s4 = smov (!%p619_p0, %s620_s4), %s617_s28 }
  0x29   : > { %s622_s29 = scalar_lea.hbm %s616_s27, %s1191_s4 }
  0x2a   : > { %p623_p1 = scmp.ne.s32.totalorder %s616_s27, %s622_s29  ;;  %p628_p7 = scmp.lt.s32.totalorder %s626_s9, %s622_s29 }
  0x2c   : > { %p624_p2 = pnand %p623_p1, %p913_p13  ;;  %p629_p8 = por %p628_p7, %p627_p4 }
  0x2e   : > { %p625_p3 = pneg %p624_p2 }
  0x30   : > { %p630_p12 = pnand %p629_p8, %p625_p3 }
  0x32   : > { %633 = shalt.err (!%p630_p12)
}
  0x33   : > { %s634_s20 = sshra.s32 %s166_s10, 4  ;;  %s815_s30 = smov [#allocation2]   ;;  %s635_s20 = int_to_ptr.vmem [resolvable:$true] %s634_s20 }
  0x34   : > { %s641_s28 = scalar_lea.vmem %s635_s20, %s1191_s4  ;;  %s645_s5 = scalar_lea.vmem %s815_s30, 144 }
  0x35   : > { %p642_p0 = scmp.ne.s32.totalorder %s635_s20, %s641_s28  ;;  %p647_p11 = scmp.lt.s32.totalorder %s645_s5, %s641_s28 }
  0x37   : > { %p643_p1 = pnand %p642_p0, %p913_p13 }
  0x39   : > { %p644_p2 = pneg %p643_p1 }
  0x3b   : > { %p649_p10 = pnand %p647_p11, %p644_p2 }
  0x3d   : > { %652 = shalt.err (!%p649_p10)
}
  0x3e   : > { %s816_s27 = smov 384   ;;  %s817_s29 = smov 24  }
  0x3f   : > { %171 = dma.hbm_to_vmem [thread:$0]  (%p913_p13), %s926_s26, %s920_s11, %s166_s10, %s910_s6, %s816_s27, %s816_s27, %s817_s29  }
  0x40 PF: > { %174 = sbr.rel (!%p886_p5) target bundleno = 106 (0x6a), region = 24  ;;  %s175_s4 = sand.u32 (%p886_p5), 1, %s813_s15  }
  0x41   : > { %s177_s7 = sand.u32 (%p886_p5), 1, %s809_s14   ;;  %s180_s17 = smul.u32 (%p886_p5), 3, %s813_s15 }
  0x42   : > { %s556_s9 = smul.u32 (%p886_p5), 72, %s177_s7  ;;  %s955_s8 = scalar_lea.sflag (%p886_p5), [#allocation6], %s175_s4 }
  0x43   : > { %s181_s19 = ssub.s32 (%p886_p5), 5, %s180_s17 }
  0x44   : > { %p182_p10 = scmp.lt.s32.totalorder (%p886_p5), %s181_s19, 3  ;;  %s179_s6 = scalar_lea.vmem (%p886_p5), [#allocation5], %s556_s9 }
  0x46   : > { %s1193_s19 = smov (!%p182_p10, %s181_s19), 3 }
  0x47   : > { %s537_s20 = smul.u32 24, %s1193_s19 }
  0x49   : > { %s186_s28 = ssub.s32 72, %s537_s20 }
  0x4a   : > { %s187_s30 = sshll.u32 %s186_s28, 4 }
  0x4b   : > { %188 = vsyncadd %s955_s8, %s187_s30  ;;  %p958_p11 = scmp.ne.s32.totalorder %s537_s20, 0  ;;  %s571_s11 = smul.u32 72, %s813_s15 }
  0x4c   : > { %s963_s26 = sshll.u32 %s179_s6, 4  ;;  %s965_s5 = smul.u32 384, %s1193_s19  ;;  %s197_s26 = int_to_ptr.vmem [resolvable:$true] %s963_s26 }
  0x4d   : > { %s192_s4 = scalar_lea.hbm %s1170_s1, %s571_s11  ;;  %s665_s11 = scalar_lea.hbm %s1170_s1, 120 }
  0x4e   : > { %s194_s7 = sshll.u32 %s192_s4, 4  ;;  %s656_s17 = sshrl.u32 %s965_s5, 4  ;;  %s971_s7 = int_to_ptr.hbm [resolvable:$true] %s194_s7 }
  0x4f   : > { %s654_s9 = sshra.s32 %s971_s7, 4  ;;  %s692_s20 = sshll.u32 %s656_s17, 4  ;;  %s655_s9 = int_to_ptr.hbm [resolvable:$true] %s654_s9 }
  0x50   : > { %p658_p13 = scmp.ne.s32.totalorder %s692_s20, %s965_s5  ;;  %s659_s28 = sadd.s32 1, %s656_s17 }
  0x51   : > { %p666_p8 = scmp.lt.s32.totalorder %s655_s9, %s1170_s1 }
  0x52   : > { %s1195_s28 = smov (!%p658_p13, %s659_s28), %s656_s17 }
  0x53   : > { %s661_s19 = scalar_lea.hbm %s655_s9, %s1195_s28 }
  0x54   : > { %p662_p3 = scmp.ne.s32.totalorder %s655_s9, %s661_s19  ;;  %p667_p12 = scmp.lt.s32.totalorder %s665_s11, %s661_s19 }
  0x56   : > { %p663_p4 = pnand %p662_p3, %p958_p11  ;;  %p668_p0 = por %p667_p12, %p666_p8 }
  0x58   : > { %p664_p7 = pneg %p663_p4 }
  0x5a   : > { %p669_p1 = pnand %p668_p0, %p664_p7 }
  0x5c   : > { %672 = shalt.err (!%p669_p1)
}
  0x5d   : > { %s673_s4 = sshra.s32 %s197_s26, 4  ;;  %s818_s20 = smov [#allocation5]   ;;  %s674_s4 = int_to_ptr.vmem [resolvable:$true] %s673_s4 }
  0x5e   : > { %s680_s17 = scalar_lea.vmem %s674_s4, %s1195_s28  ;;  %s684_s30 = scalar_lea.vmem %s818_s20, 144 }
  0x5f   : > { %p681_p2 = scmp.ne.s32.totalorder %s674_s4, %s680_s17  ;;  %p686_p3 = scmp.lt.s32.totalorder %s684_s30, %s680_s17 }
  0x61   : > { %p682_p10 = pnand %p681_p2, %p958_p11 }
  0x63   : > { %p683_p13 = pneg %p682_p10 }
  0x65   : > { %p688_p4 = pnand %p686_p3, %p683_p13 }
  0x67   : > { %691 = shalt.err (!%p688_p4)
}
  0x68   : > { %s819_s9 = smov 384   ;;  %s820_s19 = smov 24  }
  0x69   : > { %202 = dma.hbm_to_vmem [thread:$0]  (%p958_p11), %s971_s7, %s965_s5, %s197_s26, %s955_s8, %s819_s9, %s819_s9, %s820_s19  }
  0x6a PF: > { %205 = sbr.rel (!%p886_p5) target bundleno = 148 (0x94), region = 28  ;;  %s206_s28 = sand.u32 (%p886_p5), 1, %s813_s15  }
  0x6b   : > { %s208_s6 = sand.u32 (%p886_p5), 1, %s809_s14   ;;  %s211_s27 = smul.u32 (%p886_p5), 3, %s813_s15 }
  0x6c   : > { %s558_s11 = smul.u32 (%p886_p5), 72, %s208_s6  ;;  %s1000_s10 = scalar_lea.sflag (%p886_p5), [#allocation6], %s206_s28 }
  0x6d   : > { %s212_s29 = ssub.s32 (%p886_p5), 5, %s211_s27 }
  0x6e   : > { %p213_p7 = scmp.lt.s32.totalorder (%p886_p5), %s212_s29, 3  ;;  %s210_s8 = scalar_lea.vmem (%p886_p5), [#allocation7], %s558_s11 }
  0x70   : > { %s1197_s29 = smov (!%p213_p7, %s212_s29), 3 }
  0x71   : > { %s542_s4 = smul.u32 24, %s1197_s29 }
  0x73   : > { %s217_s17 = ssub.s32 72, %s542_s4 }
  0x74   : > { %s218_s20 = sshll.u32 %s217_s17, 4 }
  0x75   : > { %219 = vsyncadd %s1000_s10, %s218_s20  ;;  %p1003_p5 = scmp.ne.s32.totalorder %s542_s4, 0  ;;  %s572_s26 = smul.u32 72, %s813_s15 }
  0x76   : > { %s1008_s5 = sshll.u32 %s210_s8, 4  ;;  %s1010_s7 = smul.u32 384, %s1197_s29  ;;  %s228_s5 = int_to_ptr.vmem [resolvable:$true] %s1008_s5 }
  0x77   : > { %s223_s19 = scalar_lea.hbm %s1171_s2, %s572_s26  ;;  %s704_s8 = scalar_lea.hbm %s1171_s2, 120 }
  0x78   : > { %s225_s28 = sshll.u32 %s223_s19, 4  ;;  %s695_s11 = sshrl.u32 %s1010_s7, 4  ;;  %s1016_s28 = int_to_ptr.hbm [resolvable:$true] %s225_s28 }
  0x79   : > { %s693_s6 = sshra.s32 %s1016_s28, 4  ;;  %s731_s27 = sshll.u32 %s695_s11, 4  ;;  %s694_s6 = int_to_ptr.hbm [resolvable:$true] %s693_s6 }
  0x7a   : > { %p697_p11 = scmp.ne.s32.totalorder %s731_s27, %s1010_s7  ;;  %s698_s4 = sadd.s32 1, %s695_s11 }
  0x7b   : > { %p705_p1 = scmp.lt.s32.totalorder %s694_s6, %s1171_s2 }
  0x7c   : > { %s1199_s4 = smov (!%p697_p11, %s698_s4), %s695_s11 }
  0x7d   : > { %s700_s29 = scalar_lea.hbm %s694_s6, %s1199_s4 }
  0x7e   : > { %p701_p8 = scmp.ne.s32.totalorder %s694_s6, %s700_s29  ;;  %p706_p2 = scmp.lt.s32.totalorder %s704_s8, %s700_s29 }
  0x80   : > { %p702_p12 = pnand %p701_p8, %p1003_p5  ;;  %p707_p10 = por %p706_p2, %p705_p1 }
  0x82   : > { %p703_p0 = pneg %p702_p12 }
  0x84   : > { %p708_p13 = pnand %p707_p10, %p703_p0 }
  0x86   : > { %711 = shalt.err (!%p708_p13)
}
  0x87   : > { %s712_s9 = sshra.s32 %s228_s5, 4  ;;  %s821_s11 = smov [#allocation7]   ;;  %s713_s9 = int_to_ptr.vmem [resolvable:$true] %s712_s9 }
  0x88   : > { %s719_s19 = scalar_lea.vmem %s713_s9, %s1199_s4  ;;  %s723_s27 = scalar_lea.vmem %s821_s11, 144 }
  0x89   : > { %p720_p3 = scmp.ne.s32.totalorder %s713_s9, %s719_s19  ;;  %p725_p11 = scmp.lt.s32.totalorder %s723_s27, %s719_s19 }
  0x8b   : > { %p721_p4 = pnand %p720_p3, %p1003_p5 }
  0x8d   : > { %p722_p7 = pneg %p721_p4 }
  0x8f   : > { %p727_p8 = pnand %p725_p11, %p722_p7 }
  0x91   : > { %730 = shalt.err (!%p727_p8)
}
  0x92   : > { %s822_s6 = smov 384   ;;  %s823_s29 = smov 24  }
  0x93   : > { %233 = dma.hbm_to_vmem [thread:$0]  (%p1003_p5), %s1016_s28, %s1010_s7, %s228_s5, %s1000_s10, %s822_s6, %s822_s6, %s823_s29  }
  0x94 PF: > { %p546_p12 = scmp.ge.s32.totalorder %s813_s15, 1  ;;  %p235_p0 = scmp.lt.s32.totalorder %s813_s15, 3 }
  0x96   : > { %p236_p1 = pnand %p546_p12, %p235_p0 }
  0x97   : > { %s1043_s4 = sand.u32 (!%p236_p1), 1, %s805_s13  }
  0x98   : > { %239 = sbr.rel (%p236_p1) target bundleno = 213 (0xd5), region = 32  ;;  %s242_s22 = scalar_lea.sflag (!%p236_p1), [#allocation3], %s1043_s4 }
  0x99   : > { %s1046_s17 = smul.u32 (!%p236_p1), 72, %s1043_s4 }
  0x9b   : > { %s1050_s20 = scalar_lea.vmem (!%p236_p1), [#allocation2], %s1046_s17 }
  0x9d   : > { %788 = dma.done.wait (%p890_p6), %s242_s22, 1152  }
  0x9e   : > { %790 = vsyncadd (%p890_p6), %s242_s22, 4294966144  ;;  %s251_s10 = sand.u32 1, %s868_s16   ;;  %s1058_s7 = scalar_lea.vmem [#allocation5], %s1046_s17 }
  0x9f   : > { %s252_s5 = scalar_lea.sflag [#allocation6], %s251_s10 }
  0xa0   : > { %792 = dma.done.wait (%p890_p6), %s252_s5, 2304  }
  0xa1   : > { %794 = vsyncadd (%p890_p6), %s252_s5, 4294964992  ;;  %v323_v0 = vld [vmem:[%s1050_s20] sm:$0xff]  ;;  %v332_v1 = vld [vmem:[%s1058_s7] sm:$0xff]  ;;  %s1067_s28 = scalar_lea.vmem [#allocation7], %s1046_s17  ;;  %vm379_vm0 = vcmask 23552   ;;  %s1089_s23 = scalar_lea.vmem [#allocation8], %s1046_s17 }
  0xa2   : > { %v341_v2 = vld [vmem:[%s1067_s28] sm:$0xff]  ;;  %v350_v3 = vmul.f32 %v332_v1, %v323_v0  ;;  %v324_v4 = vld [vmem:[%s1050_s20 + $0x8] sm:$0xff]  ;;  %v333_v5 = vld [vmem:[%s1058_s7 + $0x8] sm:$0xff]  ;;  %s388_s8 = scalar_lea.sflag [#allocation4], %s1043_s4  ;;  %s395_s26 = smul.u32 (%p895_p9), 3, %s868_s16 }
  0xa3   : > { %v342_v6 = vld [vmem:[%s1067_s28 + $0x8] sm:$0xff]  ;;  %v351_v7 = vmul.f32 %v333_v5, %v324_v4  ;;  %v325_v8 = vld [vmem:[%s1050_s20 + $0x10] sm:$0xff]  ;;  %v334_v9 = vld [vmem:[%s1058_s7 + $0x10] sm:$0xff] }
  0xa4   : > { %v343_v10 = vld [vmem:[%s1067_s28 + $0x10] sm:$0xff]  ;;  %v359_v11 = vadd.f32 %v350_v3, %v341_v2  ;;  %v352_v12 = vmul.f32 %v334_v9, %v325_v8  ;;  %v326_v13 = vld [vmem:[%s1050_s20 + $0x18] sm:$0xff]  ;;  %v335_v14 = vld [vmem:[%s1058_s7 + $0x18] sm:$0xff]  ;;  %s396_s30 = ssub.s32 (%p895_p9), 5, %s395_s26 }
  0xa5   : > { %v344_v15 = vld [vmem:[%s1067_s28 + $0x18] sm:$0xff]  ;;  %v360_v16 = vadd.f32 %v351_v7, %v342_v6  ;;  %v353_v17 = vmul.f32 %v335_v14, %v326_v13  ;;  %v327_v18 = vld [vmem:[%s1050_s20 + $0x20] sm:$0xff]  ;;  %v336_v19 = vld [vmem:[%s1058_s7 + $0x20] sm:$0xff]  ;;  %p397_p6 = scmp.lt.s32.totalorder (%p895_p9), %s396_s30, 3 }
  0xa6   : > { %v345_v20 = vld [vmem:[%s1067_s28 + $0x20] sm:$0xff]  ;;  %v368_v21 = vmax.f32 %v359_v11, 0.0  ;;  %v361_v22 = vadd.f32 %v352_v12, %v343_v10  ;;  %v354_v23 = vmul.f32 %v336_v19, %v327_v18  ;;  %v328_v24 = vld [vmem:[%s1050_s20 + $0x28] sm:$0xff]  ;;  %v337_v25 = vld [vmem:[%s1058_s7 + $0x28] sm:$0xff] }
  0xa7   : > { %v346_v26 = vld [vmem:[%s1067_s28 + $0x28] sm:$0xff]  ;;  %v369_v27 = vmax.f32 %v360_v16, 0.0  ;;  %v362_v28 = vadd.f32 %v353_v17, %v344_v15  ;;  %v355_v29 = vmul.f32 %v337_v25, %v328_v24  ;;  %v329_v30 = vld [vmem:[%s1050_s20 + $0x30] sm:$0xff]  ;;  %v338_v31 = vld [vmem:[%s1058_s7 + $0x30] sm:$0xff] }
  0xa8   : > { %v347_v32 = vld [vmem:[%s1067_s28 + $0x30] sm:$0xff]  ;;  %377 = vst [vmem:[%s1089_s23] sm:$0xff] %v368_v21  ;;  %v370_v33 = vmax.f32 %v361_v22, 0.0  ;;  %v363_v34 = vadd.f32 %v354_v23, %v345_v20  ;;  %v356_v35 = vmul.f32 %v338_v31, %v329_v30  ;;  %v330_v36 = vld [vmem:[%s1050_s20 + $0x38] sm:$0xff]  ;;  %v339_v37 = vld [vmem:[%s1058_s7 + $0x38] sm:$0xff] }
  0xa9   : > { %v348_v38 = vld [vmem:[%s1067_s28 + $0x38] sm:$0xff]  ;;  %378 = vst [vmem:[%s1089_s23 + $0x8] sm:$0xff] %v369_v27  ;;  %v371_v39 = vmax.f32 %v362_v28, 0.0  ;;  %v364_v40 = vadd.f32 %v355_v29, %v346_v26  ;;  %v357_v41 = vmul.f32 %v339_v37, %v330_v36  ;;  %v331_v42 = vld [vmem:[%s1050_s20 + $0x40] sm:$0xff]  ;;  %v340_v43 = vld [vmem:[%s1058_s7 + $0x40] sm:$0xff] }
  0xaa   : > { %v349_v44 = vld [vmem:[%s1067_s28 + $0x40] sm:$0xff]  ;;  %380 = vst.msk [vmem:[%s1089_s23 + $0x10] sm:$0xff] %vm379_vm0, %v370_v33  ;;  %v372_v45 = vmax.f32 %v363_v34, 0.0  ;;  %v365_v46 = vadd.f32 %v356_v35, %v347_v32  ;;  %v358_v47 = vmul.f32 %v340_v43, %v331_v42 }
  0xab   : > { %381 = vst [vmem:[%s1089_s23 + $0x18] sm:$0xff] %v371_v39  ;;  %v373_v48 = vmax.f32 %v364_v40, 0.0  ;;  %v366_v49 = vadd.f32 %v357_v41, %v348_v38 }
  0xac   : > { %382 = vst [vmem:[%s1089_s23 + $0x20] sm:$0xff] %v372_v45  ;;  %v374_v50 = vmax.f32 %v365_v46, 0.0  ;;  %v367_v51 = vadd.f32 %v358_v47, %v349_v44  ;;  %394 = sbr.rel (!%p895_p9) target bundleno = 213 (0xd5), region = 48 }
  0xad   : > { %383 = vst.msk [vmem:[%s1089_s23 + $0x28] sm:$0xff] %vm379_vm0, %v373_v48  ;;  %v375_v52 = vmax.f32 %v366_v49, 0.0 }
  0xae   : > { %384 = vst [vmem:[%s1089_s23 + $0x30] sm:$0xff] %v374_v50  ;;  %v376_v53 = vmax.f32 %v367_v51, 0.0 }
  0xaf   : > { %385 = vst [vmem:[%s1089_s23 + $0x38] sm:$0xff] %v375_v52 }
  0xb0   : > { %386 = vst.msk [vmem:[%s1089_s23 + $0x40] sm:$0xff] %vm379_vm0, %v376_v53 }
  0xb1   : > { %s1201_s30 = smov (!%p397_p6, %s396_s30), 3 }
  0xb2   : > { %s548_s9 = smul.u32 24, %s1201_s30 }
  0xb4   : > { %s401_s19 = ssub.s32 72, %s548_s9 }
  0xb5   : > { %s402_s11 = sshll.u32 %s401_s19, 4 }
  0xb6   : > { %403 = vsyncadd %s388_s8, %s402_s11  ;;  %p1115_p5 = scmp.ne.s32.totalorder %s548_s9, 0  ;;  %s573_s6 = smul.u32 72, %s868_s16 }
  0xb7   : > { %s409_s24 = sshll.u32 %s1089_s23, 4  ;;  %s1121_s29 = smul.u32 384, %s1201_s30  ;;  %s1126_s24 = int_to_ptr.vmem [resolvable:$true] %s409_s24 }
  0xb8   : > { %s407_s20 = scalar_lea.hbm %s1172_s3, %s573_s6  ;;  %s732_s5 = sshra.s32 %s1126_s24, 4  ;;  %s733_s5 = int_to_ptr.vmem [resolvable:$true] %s732_s5 }
  0xb9   : > { %s411_s10 = sshll.u32 %s407_s20, 4  ;;  %s734_s7 = sshrl.u32 %s1121_s29, 4  ;;  %s1128_s10 = int_to_ptr.hbm [resolvable:$true] %s411_s10 }
  0xba   : > { %s770_s16 = sshll.u32 %s734_s7, 4  ;;  %s737_s28 = sadd.s32 1, %s734_s7 }
  0xbb   : > { %p736_p9 = scmp.ne.s32.totalorder %s770_s16, %s1121_s29  ;;  %s824_s26 = smov [#allocation8]  }
  0xbc   : > { %s743_s30 = scalar_lea.vmem %s824_s26, 144 }
  0xbd   : > { %s1203_s28 = smov (!%p736_p9, %s737_s28), %s734_s7 }
  0xbe   : > { %s739_s23 = scalar_lea.vmem %s733_s5, %s1203_s28 }
  0xbf   : > { %p740_p2 = scmp.ne.s32.totalorder %s733_s5, %s739_s23  ;;  %p745_p3 = scmp.lt.s32.totalorder %s743_s30, %s739_s23 }
  0xc1   : > { %p741_p10 = pnand %p740_p2, %p1115_p5 }
  0xc3   : > { %p742_p13 = pneg %p741_p10 }
  0xc5   : > { %p747_p4 = pnand %p745_p3, %p742_p13 }
  0xc7   : > { %750 = shalt.err (!%p747_p4)
}
  0xc8   : > { %s751_s9 = sshra.s32 %s1128_s10, 4  ;;  %s762_s17 = scalar_lea.hbm %s1172_s3, 120  ;;  %s752_s9 = int_to_ptr.hbm [resolvable:$true] %s751_s9 }
  0xc9   : > { %s758_s19 = scalar_lea.hbm %s752_s9, %s1203_s28  ;;  %p763_p12 = scmp.lt.s32.totalorder %s752_s9, %s1172_s3 }
  0xca   : > { %p759_p7 = scmp.ne.s32.totalorder %s752_s9, %s758_s19  ;;  %p764_p0 = scmp.lt.s32.totalorder %s762_s17, %s758_s19 }
  0xcc   : > { %p760_p11 = pnand %p759_p7, %p1115_p5  ;;  %p765_p1 = por %p764_p0, %p763_p12 }
  0xce   : > { %p761_p8 = pneg %p760_p11 }
  0xd0   : > { %p766_p6 = pnand %p765_p1, %p761_p8 }
  0xd2   : > { %769 = shalt.err (!%p766_p6)
}
  0xd3   : > { %s825_s5 = smov 384   ;;  %s826_s7 = smov 24  }
  0xd4   : > { %417 = dma.vmem_to_hbm [thread:$0]  (%p1115_p5), %s1126_s24, %s1121_s29, %s1128_s10, %s388_s8, %s825_s5, %s825_s5, %s826_s7  }
  0xd5 PF: > { %s426_s16 = sand.u32 1, %s801_s12   ;;  %p1182_p9 = scmp.ne.s32.totalorder %s1177_s25, 0 }
  0xd6   : > { %p1183_p2 = scmp.ge.s32.totalorder %s813_s15, 2  ;;  %s427_s28 = scalar_lea.sflag [#allocation4], %s426_s16 }
  0xd8   : > { %p567_p10 = pnand %p1183_p2, %p1182_p9 }
  0xda   : > { %p568_p13 = pneg %p567_p10 }
  0xdc   : > { %796 = dma.done.wait (%p568_p13), %s427_s28, 1152  }
  0xdd   : > { %798 = vsyncadd (%p568_p13), %s427_s28, 4294966144  ;;  %p19_p3 = scmp.ge.s32.totalorder %s872_s18, 4   ;;  %s1184_s12 = smov %s805_s13 }
  0xde   : > { %s1185_s13 = smov %s809_s14  ;;  %s1186_s14 = smov %s884_s21 }
  0xdf   : > { %s1187_s15 = smov %s872_s18  ;;  %21 = sbr.rel (!%p19_p3) target bundleno = 7 (0x7), region = 101 }
  0xe4   :  { %433 = vsyncpa [#allocation3], 1 }
  0xe5   :  { %435 = vsyncpa [#allocation3 + $0x1], 1 }
  0xe6   :  { %436 = vsyncpa [#allocation6], 1 }
  0xe7   :  { %438 = vsyncpa [#allocation6 + $0x1], 1 }
  0xe8   :  { %439 = vsyncpa [#allocation4], 1 }
  0xe9   :  { %441 = vsyncpa [#allocation4 + $0x1], 1 }

</bundles_post_ra>
